<compile_context>
chip_gen: v6e
topology: v6e:2x2x1
jax: 0.10.0
libtpu: 0.0.40
codegen_flags: <defaults>
</compile_context>

<pallas_src>
import math

import jax
import jax.numpy as jnp
from jax import lax
from jax.experimental import pallas as pl
from jax.experimental.pallas import tpu as pltpu

EPS = 1e-5  # matches torch.nn.LayerNorm default


def _round_up(a, b):
    return (a + b - 1) // b * b


def _vmem_capacity_bytes():
    """Per-TensorCore VMEM capacity; conservative v7x default if unknown."""
    try:
        cap = getattr(pltpu.get_tpu_info(), "vmem_capacity_bytes", None)
        if cap:
            return int(cap)
    except Exception:  # heuristic only — never affects numerics
        pass
    return 64 << 20


def _make_kernels(dim, Dp, matmul_dtype):
    """Kernel factory: closes over real / padded feature dims and matmul dtype."""
    inv_dim = 1.0 / dim
    need_mask = Dp != dim

    def _norm_and_store(y, c_ref, o_ref):
        # LayerNorm over the REAL feature dim: sum * (1/dim), no divides.
        mean = jnp.sum(y, axis=-1, keepdims=True) * inv_dim
        centered = y - mean
        if need_mask:
            # Precomputed (1, Dp) mask (1.0 for real cols, 0.0 for padding):
            # zero padded feature columns so they don't pollute the variance.
            centered = centered * c_ref[3:4, :]
        var = jnp.sum(centered * centered, axis=-1, keepdims=True) * inv_dim
        inv = lax.rsqrt(var + EPS)
        out = centered * inv * c_ref[1:2, :] + c_ref[2:3, :]
        o_ref[...] = out.astype(o_ref.dtype)

    def resident_kernel(x_ref, w_ref, c_ref, o_ref):
        # Weight fully resident in VMEM: single dot, no accumulator round-trip.
        y = jnp.dot(x_ref[...].astype(matmul_dtype), w_ref[...],
                    preferred_element_type=jnp.float32) + c_ref[0:1, :]
        _norm_and_store(y, c_ref, o_ref)

    def streamed_kernel(x_ref, w_ref, c_ref, o_ref, acc_ref):
        k = pl.program_id(1)
        part = jnp.dot(x_ref[...].astype(matmul_dtype), w_ref[...],
                       preferred_element_type=jnp.float32)

        @pl.when(k == 0)
        def _first():
            acc_ref[...] = part            # write-on-first-step: no zero fill

        @pl.when(k != 0)
        def _rest():
            acc_ref[...] = acc_ref[...] + part

        @pl.when(k == pl.num_programs(1) - 1)
        def _finalize():
            _norm_and_store(acc_ref[...] + c_ref[0:1, :], c_ref, o_ref)

    return resident_kernel, streamed_kernel


def postnorm(x, w, b, gamma, beta, *, tm=None, matmul_dtype=jnp.bfloat16):
    """PostNorm with net = nn.Linear(dim, dim): LayerNorm(x @ W^T + b).

    x: (batch, seq, dim).  w: (dim, dim) laid out (in, out), i.e. W.T of the
    PyTorch Linear.  b, gamma, beta: (dim,).
    """
    batch, seq, dim = x.shape
    M = batch * seq
    Dp = _round_up(dim, 128)                 # lane-dense last dim

    x_bytes = jnp.dtype(x.dtype).itemsize
    mm_bytes = jnp.dtype(matmul_dtype).itemsize
    out_bytes = x_bytes

    # ---- generation-aware tiling / padding decisions --------------------
    vmem_cap = _vmem_capacity_bytes()
    big_vmem = vmem_cap >= (96 << 20)        # v5e / v6e: 128 MiB per TC
    resident_threshold = (40 << 20) if big_vmem else (16 << 20)
    vmem_budget = (100 << 20) if big_vmem else (52 << 20)

    weight_bytes = Dp * Dp * mm_bytes
    if weight_bytes <= resident_threshold:
        tk = Dp                              # whole weight resident in VMEM
        tm_default = 256
    else:
        tk = min(1024 if big_vmem else 512, Dp)   # stream weight over K
        while Dp % tk:
            tk -= 128
        tm_default = 512 if big_vmem else 256

    tm = tm_default if tm is None else tm
    tm = max(16, min(tm, _round_up(M, 16)))  # don't over-pad tiny inputs
    tm = _round_up(tm, 16)

    def vmem_est(tm_, tk_):
        est = (2 * tm_ * tk_ * x_bytes       # x tiles (double-buffered, native dtype)
               + 2 * tk_ * Dp * mm_bytes     # weight tiles (double-buffered)
               + 2 * tm_ * Dp * out_bytes    # output tiles (double-buffered)
               + 2 * 4 * Dp * 4)             # packed (bias, gamma, beta, mask)
        if Dp // tk_ > 1:
            est += tm_ * Dp * 4              # f32 accumulator scratch
        return est

    # Shrink the row tile if it would blow the per-generation VMEM budget
    # (v7x only has 64 MiB per TC).
    while vmem_est(tm, tk) > vmem_budget and tm > 64:
        tm = max(64, tm // 2)
    # TODO(synk): for very large dim on v7x an N-tiled two-pass LayerNorm
    # (carrying per-row sum / sum-of-squares partials) would be needed; this
    # kernel keeps single-pass full-row output tiles.

    nk = Dp // tk
    M_pad = _round_up(M, tm)

    est = vmem_est(tm, tk)
    vmem_limit = None
    if est > (12 << 20):
        vmem_limit = min(int(est * 1.25) + (2 << 20), vmem_budget)

    # ---- operand prep (x stays in native dtype; cast happens in-kernel) --
    x2 = x.reshape(M, dim)
    if (M_pad, Dp) != (M, dim):
        # Zero padding keeps padded matmul contributions exactly 0 (w's padded
        # rows are zero as well).
        x2 = jnp.pad(x2, ((0, M_pad - M), (0, Dp - dim)))

    w_p = w.astype(matmul_dtype)
    if Dp != dim:
        w_p = jnp.pad(w_p, ((0, Dp - dim), (0, Dp - dim)))

    # bias / gamma / beta / column-mask packed into one (4, Dp) constant.
    consts = jnp.zeros((4, Dp), jnp.float32)
    consts = consts.at[0, :dim].set(b.astype(jnp.float32))
    consts = consts.at[1, :dim].set(gamma.astype(jnp.float32))
    consts = consts.at[2, :dim].set(beta.astype(jnp.float32))
    consts = consts.at[3, :dim].set(1.0)

    resident_kernel, streamed_kernel = _make_kernels(dim, Dp, matmul_dtype)

    weight_passes = 1 if nk == 1 else (M_pad // tm)   # weight re-streamed per row tile
    cost = pl.CostEstimate(
        flops=2 * M_pad * Dp * Dp,
        transcendentals=M_pad,                        # one rsqrt per row
        bytes_accessed=int(M_pad * Dp * x_bytes
                           + weight_passes * Dp * Dp * mm_bytes
                           + M_pad * Dp * out_bytes
                           + 4 * Dp * 4))

    if nk == 1:
        # Resident-weight path: 1-D grid over row tiles, no accumulator.
        grid_spec = pltpu.PrefetchScalarGridSpec(
            num_scalar_prefetch=0,
            grid=(M_pad // tm,),
            in_specs=[
                pl.BlockSpec((tm, Dp), lambda i: (i, 0)),   # x rows
                pl.BlockSpec((Dp, Dp), lambda i: (0, 0)),   # resident weight
                pl.BlockSpec((4, Dp), lambda i: (0, 0)),    # packed constants
            ],
            out_specs=pl.BlockSpec((tm, Dp), lambda i: (i, 0)),
        )
        kernel = resident_kernel
        # Row axis is "parallel" so megacore / v7x dual-TC sharding can split it.
        dim_sem = ("parallel",)
    else:
        # Streamed-weight path: K reduction axis last, accumulator scratch.
        grid_spec = pltpu.PrefetchScalarGridSpec(
            num_scalar_prefetch=0,
            grid=(M_pad // tm, nk),
            in_specs=[
                pl.BlockSpec((tm, tk), lambda i, k: (i, k)),   # x rows
                pl.BlockSpec((tk, Dp), lambda i, k: (k, 0)),   # weight K slab
                pl.BlockSpec((4, Dp), lambda i, k: (0, 0)),    # packed constants
            ],
            out_specs=pl.BlockSpec((tm, Dp), lambda i, k: (i, 0)),
            scratch_shapes=[pltpu.VMEM((tm, Dp), jnp.float32)],
        )
        kernel = streamed_kernel
        dim_sem = ("parallel", "arbitrary")

    out2 = pl.pallas_call(
        kernel,
        out_shape=jax.ShapeDtypeStruct((M_pad, Dp), x.dtype),
        grid_spec=grid_spec,
        compiler_params=pltpu.CompilerParams(
            dimension_semantics=dim_sem,
            vmem_limit_bytes=vmem_limit),
        cost_estimate=cost,
    )(x2, w_p, consts)

    return out2[:M, :dim].reshape(batch, seq, dim)


def postnorm_ref(x, w, b, gamma, beta, matmul_dtype=jnp.bfloat16):
    """Pure-JAX reference matching the kernel's matmul dtype path."""
    y = jnp.einsum("bsd,de->bse",
                   x.astype(matmul_dtype), w.astype(matmul_dtype),
                   preferred_element_type=jnp.float32) + b
    mean = jnp.mean(y, axis=-1, keepdims=True)
    var = jnp.mean((y - mean) ** 2, axis=-1, keepdims=True)
    y_hat = (y - mean) * lax.rsqrt(var + EPS)
    return (y_hat * gamma + beta).astype(x.dtype)


if __name__ == "__main__":
    key = jax.random.PRNGKey(0)
    k_x, k_w, k_b = jax.random.split(key, 3)

    batch, seq, dim = 2, 8, 32
    x = jax.random.normal(k_x, (batch, seq, dim), dtype=jnp.float32)

    # Deterministic parameter init (Linear: W (out,in) -> stored transposed).
    bound = 1.0 / math.sqrt(dim)
    w_t = jax.random.uniform(k_w, (dim, dim), jnp.float32, -bound, bound)  # (in, out)
    b = jax.random.uniform(k_b, (dim,), jnp.float32, -bound, bound)
    gamma = jnp.ones((dim,), jnp.float32)   # LayerNorm default init
    beta = jnp.zeros((dim,), jnp.float32)

    out = postnorm(x, w_t, b, gamma, beta)
    out = jax.block_until_ready(out)
    assert out.shape == (batch, seq, dim)

    # Tight check against a reference using the same bf16-matmul/f32-accum path.
    ref = postnorm_ref(x, w_t, b, gamma, beta)
    assert jnp.allclose(out, ref, atol=1e-3, rtol=1e-3), float(
        jnp.max(jnp.abs(out - ref)))

    # Loose sanity check against the full-f32 reference (bf16 rounding only).
    ref_f32 = postnorm_ref(x, w_t, b, gamma, beta, matmul_dtype=jnp.float32)
    assert jnp.allclose(out, ref_f32, atol=1e-1, rtol=1e-1)

    print("KERNEL_OK")
</pallas_src>

<mosaic_0001>
module attributes {stable_mosaic.version = 11 : i64} {
  func.func @resident_kernel(%arg0: i32, %arg1: memref<16x128xf32, #tpu.memory_space<vmem>>, %arg2: memref<128x128xbf16, #tpu.memory_space<vmem>>, %arg3: memref<4x128xf32, #tpu.memory_space<vmem>>, %arg4: memref<16x128xf32, #tpu.memory_space<vmem>>) attributes {dimension_semantics = [#tpu.dimension_semantics<parallel>], iteration_bounds = array<i64: 1>, scalar_prefetch = 0 : i64, scratch_operands = 0 : i64, tpu.core_type = #tpu.core_type<tc>, window_params = [{transform_indices = @transform_0, window_bounds = array<i64: 16, 128>}, {pipeline_mode = #tpu.pipeline_mode<synchronous>, transform_indices = @transform_1, window_bounds = array<i64: 128, 128>}, {pipeline_mode = #tpu.pipeline_mode<synchronous>, transform_indices = @transform_2, window_bounds = array<i64: 4, 128>}, {transform_indices = @transform_3, window_bounds = array<i64: 16, 128>}]} {
    %c0 = arith.constant 0 : index
    %c0_0 = arith.constant 0 : index
    %0 = vector.load %arg1[%c0, %c0_0] : memref<16x128xf32, #tpu.memory_space<vmem>>, vector<16x128xf32>
    %1 = arith.truncf %0 : vector<16x128xf32> to vector<16x128xbf16>
    %c0_1 = arith.constant 0 : index
    %c0_2 = arith.constant 0 : index
    %2 = vector.load %arg2[%c0_1, %c0_2] : memref<128x128xbf16, #tpu.memory_space<vmem>>, vector<128x128xbf16>
    %cst = arith.constant dense<0.000000e+00> : vector<16x128xf32>
    %3 = tpu.matmul %1, %2, %cst {dimension_numbers = #tpu.dot_dimension_numbers<[1], [0], [0], [1], [0, 0, 1, 1], [], []>} : vector<16x128xbf16>, vector<128x128xbf16>, vector<16x128xf32> -> vector<16x128xf32>
    %c0_3 = arith.constant 0 : index
    %c0_4 = arith.constant 0 : index
    %4 = vector.load %arg3[%c0_3, %c0_4] : memref<4x128xf32, #tpu.memory_space<vmem>>, vector<1x128xf32>
    %5 = vector.broadcast %4 : vector<1x128xf32> to vector<16x128xf32>
    %6 = arith.addf %3, %5 : vector<16x128xf32>
    %cst_5 = arith.constant dense<0.000000e+00> : vector<16xf32>
    %7 = vector.multi_reduction <add>, %6, %cst_5 [1] : vector<16x128xf32> to vector<16xf32>
    %8 = vector.shape_cast %7 : vector<16xf32> to vector<16x1xf32>
    %cst_6 = arith.constant 3.125000e-02 : f32
    %9 = vector.broadcast %cst_6 : f32 to vector<16x1xf32>
    %10 = arith.mulf %8, %9 : vector<16x1xf32>
    %11 = vector.broadcast %10 : vector<16x1xf32> to vector<16x128xf32>
    %12 = arith.subf %6, %11 : vector<16x128xf32>
    %c3 = arith.constant 3 : index
    %c0_7 = arith.constant 0 : index
    %13 = vector.load %arg3[%c3, %c0_7] : memref<4x128xf32, #tpu.memory_space<vmem>>, vector<1x128xf32>
    %14 = vector.broadcast %13 : vector<1x128xf32> to vector<16x128xf32>
    %15 = arith.mulf %12, %14 : vector<16x128xf32>
    %16 = arith.mulf %15, %15 : vector<16x128xf32>
    %cst_8 = arith.constant dense<0.000000e+00> : vector<16xf32>
    %17 = vector.multi_reduction <add>, %16, %cst_8 [1] : vector<16x128xf32> to vector<16xf32>
    %18 = vector.shape_cast %17 : vector<16xf32> to vector<16x1xf32>
    %cst_9 = arith.constant 3.125000e-02 : f32
    %19 = vector.broadcast %cst_9 : f32 to vector<16x1xf32>
    %20 = arith.mulf %18, %19 : vector<16x1xf32>
    %cst_10 = arith.constant 9.99999974E-6 : f32
    %21 = vector.broadcast %cst_10 : f32 to vector<16x1xf32>
    %22 = arith.addf %20, %21 : vector<16x1xf32>
    %23 = math.rsqrt %22 : vector<16x1xf32>
    %24 = vector.broadcast %23 : vector<16x1xf32> to vector<16x128xf32>
    %25 = arith.mulf %15, %24 : vector<16x128xf32>
    %c1 = arith.constant 1 : index
    %c0_11 = arith.constant 0 : index
    %26 = vector.load %arg3[%c1, %c0_11] : memref<4x128xf32, #tpu.memory_space<vmem>>, vector<1x128xf32>
    %27 = vector.broadcast %26 : vector<1x128xf32> to vector<16x128xf32>
    %28 = arith.mulf %25, %27 : vector<16x128xf32>
    %c2 = arith.constant 2 : index
    %c0_12 = arith.constant 0 : index
    %29 = vector.load %arg3[%c2, %c0_12] : memref<4x128xf32, #tpu.memory_space<vmem>>, vector<1x128xf32>
    %30 = vector.broadcast %29 : vector<1x128xf32> to vector<16x128xf32>
    %31 = arith.addf %28, %30 : vector<16x128xf32>
    %c0_13 = arith.constant 0 : index
    %c0_14 = arith.constant 0 : index
    %32 = vector.load %arg4[%c0_13, %c0_14] : memref<16x128xf32, #tpu.memory_space<vmem>>, vector<16x128xf32>
    tpu.vector_store %arg4[%c0_13, %c0_14], %31 {strides = array<i32>} : memref<16x128xf32, #tpu.memory_space<vmem>>, vector<16x128xf32>,
    return
  }
  func.func @transform_0(%arg0: i32) -> (i32, i32) {
    %c0_i32 = arith.constant 0 : i32
    %c0_i32_0 = arith.constant 0 : i32
    return %arg0, %c0_i32 : i32, i32
  }
  func.func @transform_1(%arg0: i32) -> (i32, i32) {
    %c0_i32 = arith.constant 0 : i32
    %c0_i32_0 = arith.constant 0 : i32
    %c0_i32_1 = arith.constant 0 : i32
    return %c0_i32, %c0_i32_0 : i32, i32
  }
  func.func @transform_2(%arg0: i32) -> (i32, i32) {
    %c0_i32 = arith.constant 0 : i32
    %c0_i32_0 = arith.constant 0 : i32
    %c0_i32_1 = arith.constant 0 : i32
    return %c0_i32, %c0_i32_0 : i32, i32
  }
  func.func @transform_3(%arg0: i32) -> (i32, i32) {
    %c0_i32 = arith.constant 0 : i32
    %c0_i32_0 = arith.constant 0 : i32
    return %arg0, %c0_i32 : i32, i32
  }
}

</mosaic_0001>

<bundles_post_ra>
// kernel: tpu_custom_call.1
= control target key start
LH: loop header
LB: loop body
LE: loop exit
PB: predicated region body
PF: predicated region fallthrough
CT: control target
= control target key end

     0   :  { %8 = vsyncpa [#allocation3], 0  ;;  %s428_s0 = inlined_call_operand.hbm [shape: f32[16,128], index: 0, kind: input, shape index: {}]   ;;  %s429_s1 = inlined_call_operand.hbm [shape: bf16[128,128], index: 1, kind: input, shape index: {}]   ;;  %s430_s2 = inlined_call_operand.hbm [shape: f32[4,128], index: 2, kind: input, shape index: {}]   ;;  %s431_s3 = inlined_call_operand.hbm [shape: f32[16,128], index: 3, kind: output, shape index: {}]  }
   0x1   :  { %9 = vsyncpa [#allocation6], 0 }
   0x2   :  { %10 = vsyncpa [#allocation4], 0  ;;  %s380_s12 = smov [#allocation5]  }
   0x3   :  { %s28_s13 = sshll.u32 %s380_s12, 4  ;;  %s29_s13 = int_to_ptr.vmem [resolvable:$true] %s28_s13 }
   0x4   :  { %s302_s14 = scalar_lea.vmem %s29_s13, 1024  ;;  %p307_p1 = scmp.lt.s32.totalorder %s29_s13, %s29_s13 }
   0x5   :  { %p303_p0 = scmp.ne.s32.totalorder %s29_s13, %s302_s14  ;;  %p308_p2 = scmp.lt.s32.totalorder %s302_s14, %s302_s14 }
   0x7   :  { %p309_p3 = por %p308_p2, %p307_p1 }
   0x9   :  { %p310_p4 = pnand %p309_p3, %p303_p0 }
   0xb   :  { %313 = shalt.err (!%p310_p4)
}
   0xc   :  { %s381_s15 = smov 64   ;;  %s382_s16 = smov 4  }
   0xd   :  { %34 = dma.hbm_to_vmem [thread:$0]  %s429_s1, 1024, %s29_s13, [#allocation6], %s381_s15, %s381_s15, %s382_s16  }
   0xe   :  { %s383_s19 = smov [#allocation2]  }
   0xf   :  { %s16_s20 = sshll.u32 %s383_s19, 4  ;;  %s17_s20 = int_to_ptr.vmem [resolvable:$true] %s16_s20 }
  0x10   :  { %s322_s21 = scalar_lea.vmem %s17_s20, 256  ;;  %p327_p6 = scmp.lt.s32.totalorder %s17_s20, %s17_s20 }
  0x11   :  { %p323_p5 = scmp.ne.s32.totalorder %s17_s20, %s322_s21  ;;  %p328_p7 = scmp.lt.s32.totalorder %s322_s21, %s322_s21 }
  0x13   :  { %p329_p8 = por %p328_p7, %p327_p6 }
  0x15   :  { %p330_p9 = pnand %p329_p8, %p323_p5 }
  0x17   :  { %333 = shalt.err (!%p330_p9)
}
  0x18   :  { %s384_s22 = smov 128   ;;  %s385_s23 = smov 8  }
  0x19   :  { %22 = dma.hbm_to_vmem [thread:$0]  %s428_s0, 256, %s17_s20, [#allocation3], %s384_s22, %s384_s22, %s385_s23  }
  0x1a   :  { %s386_s1 = smov [#allocation7]  }
  0x1b   :  { %s41_s26 = sshll.u32 %s386_s1, 4  ;;  %s42_s26 = int_to_ptr.vmem [resolvable:$true] %s41_s26 }
  0x1c   :  { %s342_s27 = scalar_lea.vmem %s42_s26, 64  ;;  %p347_p11 = scmp.lt.s32.totalorder %s42_s26, %s42_s26 }
  0x1d   :  { %p343_p10 = scmp.ne.s32.totalorder %s42_s26, %s342_s27  ;;  %p348_p12 = scmp.lt.s32.totalorder %s342_s27, %s342_s27 }
  0x1f   :  { %p349_p13 = por %p348_p12, %p347_p11 }
  0x21   :  { %p350_p0 = pnand %p349_p13, %p343_p10 }
  0x23   :  { %353 = shalt.err (!%p350_p0)
}
  0x24   :  { %44 = dma.hbm_to_vmem [thread:$0]  %s430_s2, 64, %s42_s26, [#allocation6]  }
  0x25   :  { %374 = dma.done.wait [#allocation3], 256  }
  0x26   :  { %375 = vsyncadd [#allocation3], 4294967040 }
  0x27   :  { %376 = dma.done.wait [#allocation6], 1088  }
  0x28   :  { %377 = vsyncadd [#allocation6], 4294966208  ;;  %v387_v0 = vmov 0.0   ;;  %vm388_vm0 = vmmov 0   ;;  %v282_v1 = vld [vmem:[#allocation5 + $0x38] sm:$0xff]   ;;  %v283_v2 = vld [vmem:[#allocation5 + $0x30] sm:$0xff]  }
  0x29   :  { %252 = vmatprep.subr.bf16.mxu0 %v387_v0  ;;  %268 = vmatprep.mubr.msk.bf16.mxu0 %vm388_vm0, %v387_v0  ;;  %v284_v3 = vld [vmem:[#allocation5 + $0x28] sm:$0xff]   ;;  %v285_v4 = vld [vmem:[#allocation5 + $0x20] sm:$0xff]   ;;  %v286_v5 = vld [vmem:[#allocation5 + $0x18] sm:$0xff]   ;;  %s389_s0 = smov [#allocation8]  }
  0x2a   :  { %253 = vmatpush3.bf16.msra.mxu0 %v282_v1  ;;  %v287_v6 = vld [vmem:[#allocation5 + $0x10] sm:$0xff]   ;;  %v288_v7 = vld [vmem:[#allocation5 + $0x8] sm:$0xff]   ;;  %v289_v8 = vld [vmem:[#allocation5] sm:$0xff]   ;;  %s218_s2 = sshll.u32 %s389_s0, 4  ;;  %s219_s2 = int_to_ptr.vmem [resolvable:$true] %s218_s2 }
  0x2b   :  { %254 = vmatprep.subr.bf16.mxu0 %v387_v0  ;;  %v55_v9 = vld [vmem:[#allocation2] sm:$0xff]  ;;  %v56_v10 = vld [vmem:[#allocation2 + $0x8] sm:$0xff]  ;;  %v231_v12 = vld [vmem:[#allocation7] ss:$0 sm:$0xff]  ;;  %s354_s30 = scalar_lea.vmem %s219_s2, 256  ;;  %p359_p2 = scmp.lt.s32.totalorder %s219_s2, %s219_s2 }
  0x2c   :  { %v57_v11 = vpack.c.bf16 %v56_v10, %v55_v9  ;;  %v240_v21 = vld [vmem:[#allocation7 + $0x3] ss:$0 sm:$0xff]  ;;  %v241_v37 = vld [vmem:[#allocation7 + $0x1] ss:$0 sm:$0xff]  ;;  %v242_v39 = vld [vmem:[#allocation7 + $0x2] ss:$0 sm:$0xff]  ;;  %p355_p1 = scmp.ne.s32.totalorder %s219_s2, %s354_s30  ;;  %p360_p3 = scmp.lt.s32.totalorder %s354_s30, %s354_s30 }
  0x2e   :  { %255 = vmatpush3.bf16.msra.mxu0 %v283_v2  ;;  %p361_p4 = por %p360_p3, %p359_p2 }
  0x2f   :  { %256 = vmatprep.subr.bf16.mxu0 %v387_v0 }
  0x30   :  { %p362_p5 = pnand %p361_p4, %p355_p1 }
  0x32   :  { %257 = vmatpush3.bf16.msra.mxu0 %v284_v3 }
  0x33   :  { %258 = vmatprep.subr.bf16.mxu0 %v387_v0 }
  0x36   :  { %259 = vmatpush3.bf16.msra.mxu0 %v285_v4 }
  0x37   :  { %260 = vmatprep.subr.bf16.mxu0 %v387_v0 }
  0x3a   :  { %261 = vmatpush3.bf16.msra.mxu0 %v286_v5 }
  0x3b   :  { %262 = vmatprep.subr.bf16.mxu0 %v387_v0 }
  0x3e   :  { %263 = vmatpush3.bf16.msra.mxu0 %v287_v6 }
  0x3f   :  { %264 = vmatprep.subr.bf16.mxu0 %v387_v0 }
  0x42   :  { %265 = vmatpush3.bf16.msra.mxu0 %v288_v7 }
  0x43   :  { %266 = vmatprep.subr.bf16.mxu0 %v387_v0 }
  0x46   :  { %267 = vmatpush3.bf16.msra.mxu0 %v289_v8 }
  0x49   :  { %269 = vmatmul.mubr.bf16.vlgmr.msra.gmra.mxu0 %v57_v11 }
 0x109   :  { %v161_v13 = vpop.f32.mrf.mxu0 }
 0x10a   :  { %v162_v14 = vadd.f32 %v231_v12, %v161_v13 }
 0x10b   :  { %v270_v15 = vpop.f32.mrf.mxu0 }
 0x10c   :  { %168 = vadd.xlane.f32.xlu0 %v162_v14 }
 0x10d   :  { %v164_v16 = vpop.f32.mrf.mxu0 }
 0x10e   :  { %v165_v17 = vadd.f32 %v231_v12, %v164_v16 }
 0x10f   :  { %v271_v18 = vpop.f32.mrf.mxu0 }
 0x110   :  { %170 = vadd.xlane.f32.xlu0 %v165_v17 }
 0x195   :  { %v169_v19 = vpop.xlane.xlu0 %168 }
 0x196   :  { %v172_v20 = vmul.f32 0.03125, %v169_v19 }
 0x198   :  { %v174_v22 = vsub.f32 %v162_v14, %v172_v20 }
 0x199   :  { %v171_v23 = vpop.xlane.xlu0 %170 }
 0x19a   :  { %v173_v24 = vmul.f32 0.03125, %v171_v23  ;;  %v181_v25 = vmul.f32 %v240_v21, %v174_v22 }
 0x19c   :  { %v175_v26 = vsub.f32 %v165_v17, %v173_v24  ;;  %v183_v27 = vmul.f32 %v181_v25, %v181_v25 }
 0x19e   :  { %185 = vadd.xlane.f32.xlu1 %v183_v27  ;;  %v182_v28 = vmul.f32 %v240_v21, %v175_v26 }
 0x1a0   :  { %v184_v29 = vmul.f32 %v182_v28, %v182_v28 }
 0x1a2   :  { %187 = vadd.xlane.f32.xlu1 %v184_v29 }
 0x227   :  { %v186_v30 = vpop.xlane.xlu1 %185 }
 0x228   :  { %v189_v31 = vmul.f32 0.03125, %v186_v30 }
 0x22a   :  { %v191_v32 = vadd.f32 1e-05, %v189_v31 }
 0x22b   :  { %v188_v33 = vpop.xlane.xlu1 %187 }
 0x22c   :  { %290 = vrsqrt.f32 %v191_v32  ;;  %v190_v34 = vmul.f32 0.03125, %v188_v33 }
 0x22e   :  { %v192_v35 = vadd.f32 1e-05, %v190_v34 }
 0x230   :  { %292 = vrsqrt.f32 %v192_v35 }
 0x239   :  { %v291_v36 = vpop.eup %290 }
 0x23a   :  { %v195_v38 = vmul.f32 %v291_v36, %v181_v25 }
 0x23c   :  { %v202_v40 = vmul.f32 %v241_v37, %v195_v38 }
 0x23d   :  { %v293_v41 = vpop.eup %292 }
 0x23e   :  { %v196_v42 = vmul.f32 %v293_v41, %v182_v28  ;;  %v209_v43 = vadd.f32 %v242_v39, %v202_v40 }
 0x240   :  { %v203_v44 = vmul.f32 %v241_v37, %v196_v42  ;;  %211 = vst [vmem:[#allocation8] sm:$0xff] %v209_v43 }
 0x242   :  { %v210_v45 = vadd.f32 %v242_v39, %v203_v44 }
 0x244   :  { %212 = vst [vmem:[#allocation8 + $0x8] sm:$0xff] %v210_v45 }
 0x245   :  { %365 = shalt.err (!%p362_p5)
}
 0x246   :  { %224 = dma.vmem_to_hbm [thread:$0]  %s219_s2, 256, %s431_s3, [#allocation4], %s384_s22, %s384_s22, %s385_s23  }
 0x247   :  { %378 = dma.done.wait [#allocation4], 256  }
 0x248   :  { %379 = vsyncadd [#allocation4], 4294967040 }
 0x249   :  { %228 = vsyncpa [#allocation3], 1 }
 0x24a   :  { %229 = vsyncpa [#allocation6], 1 }
 0x24b   :  { %230 = vsyncpa [#allocation4], 1 }

</bundles_post_ra>
